<compile_context>
chip_gen: v5e
topology: v5e:2x2
jax: 0.10.0
libtpu: 0.0.40
codegen_flags: <defaults>
</compile_context>

<pallas_src>
import functools

import jax
import jax.numpy as jnp
from jax.experimental import pallas as pl
from jax.experimental.pallas import tpu as pltpu


def _round_up(n, m):
    return ((n + m - 1) // m) * m


def _rnn_fc_kernel(*refs, T, B, H, n_layers):
    """Single-invocation multi-layer Elman RNN + final Linear.

    refs (n_layers > 1):
      x_ref        : (T*B, I)     time-major, batch-padded input (flattened)
      w_ih0_ref    : (I, H)       layer-0 input weights (transposed)
      w_hh0_ref    : (H, H)       layer-0 recurrent weights (transposed)
      b0_ref       : (1, H)       layer-0 bias (b_ih + b_hh)
      w_ih_rest_ref: (L-1, H, H)  layers 1..L-1 input weights (transposed)
      w_hh_rest_ref: (L-1, H, H)  layers 1..L-1 recurrent weights (transposed)
      b_rest_ref   : (L-1, 1, H)  layers 1..L-1 bias (b_ih + b_hh)
      w_fc_ref     : (H, C_pad)   classifier weights (transposed, lane-padded)
      b_fc_ref     : (1, C_pad)   classifier bias (lane-padded)
      out_ref      : (B, C_pad)   logits
    """
    if n_layers > 1:
        (x_ref, w_ih0_ref, w_hh0_ref, b0_ref,
         w_ih_rest_ref, w_hh_rest_ref, b_rest_ref,
         w_fc_ref, b_fc_ref, out_ref) = refs
    else:
        (x_ref, w_ih0_ref, w_hh0_ref, b0_ref,
         w_fc_ref, b_fc_ref, out_ref) = refs
        w_ih_rest_ref = w_hh_rest_ref = b_rest_ref = None

    # Layer-0 input projection hoisted out of the recurrence: one batched
    # (T*B, I) x (I, H) matmul, bias folded in (independent of h).
    x_proj = (
        jnp.dot(x_ref[...], w_ih0_ref[...], preferred_element_type=jnp.float32)
        + b0_ref[...]
    )

    # Hoist all weight loads above the wavefront loop (read from VMEM once).
    w_hh0 = w_hh0_ref[...]
    if n_layers > 1:
        w_ih_rest = [w_ih_rest_ref[l] for l in range(n_layers - 1)]
        w_hh_rest = [w_hh_rest_ref[l] for l in range(n_layers - 1)]
        b_rest = [b_rest_ref[l] for l in range(n_layers - 1)]
    w_fc = w_fc_ref[...]
    b_fc = b_fc_ref[...]

    # Hidden state stays in registers (loop-carried values, no VMEM scratch).
    h = [jnp.zeros((B, H), jnp.float32) for _ in range(n_layers)]

    # Diagonal wavefront: wave step s updates layer l at time t = s - l.
    # All updates inside one wave step read only values produced at wave s-1,
    # so they are independent and can overlap on MXU/VPU/EUP.
    # TODO(synk): if T ever grows past ~64, replace the full unroll with
    # lax.fori_loop(..., unroll=4..8) to bound live ranges / compile time.
    for s in range(T + n_layers - 1):
        new_h = list(h)
        for l in range(n_layers):
            t = s - l
            if not (0 <= t < T):
                continue
            if l == 0:
                new_h[0] = jnp.tanh(
                    x_proj[t * B:(t + 1) * B, :]
                    + jnp.dot(h[0], w_hh0,
                              preferred_element_type=jnp.float32))
            else:
                # Two dots feeding one f32 accumulate (no concat on the
                # critical path; MRB in-place accumulation on v7x).
                new_h[l] = jnp.tanh(
                    jnp.dot(h[l - 1], w_ih_rest[l - 1],
                            preferred_element_type=jnp.float32)
                    + jnp.dot(h[l], w_hh_rest[l - 1],
                              preferred_element_type=jnp.float32)
                    + b_rest[l - 1])
        h = new_h

    # Final Linear on the last timestep's top-layer output (lane-dense store).
    out_ref[...] = (
        jnp.dot(h[n_layers - 1], w_fc, preferred_element_type=jnp.float32)
        + b_fc)


@functools.partial(jax.jit, static_argnames=("n_layers", "hidden_n", "n_class"))
def rnn_model_forward(x, params, *, n_layers, hidden_n, n_class):
    """x: (B, T, I) float32 (batch_first, like the PyTorch module)."""
    B, T, I = x.shape
    H = hidden_n
    B_pad = _round_up(B, 8)                  # full sublane group
    C_pad = params["w_fc"].shape[1]          # classifier pre-padded to 128 lanes

    # time-major, batch-padded, flattened -> single layer-0 projection matmul.
    x_tm = jnp.transpose(x, (1, 0, 2))                            # (T, B, I)
    if B_pad > B:
        x_tm = jnp.pad(x_tm, ((0, 0), (0, B_pad - B), (0, 0)))
    x_flat = x_tm.reshape(T * B_pad, I)

    # VMEM-residency guard (v7x has only 64 MiB VMEM / 32 MiB default scoped).
    # TODO(synk): switch to a 1-D time-block grid with VMEM-scratch hidden
    # state if the sequence ever outgrows VMEM.
    if x_flat.size * 4 > 16 * 1024 * 1024:
        raise NotImplementedError("sequence too large for whole-VMEM design")

    kernel = functools.partial(
        _rnn_fc_kernel, T=T, B=B_pad, H=H, n_layers=n_layers)

    args = [x_flat, params["w_ih0"], params["w_hh0"], params["b0"]]
    if n_layers > 1:
        args += [params["w_ih_rest"], params["w_hh_rest"], params["b_rest"]]
    args += [params["w_fc"], params["b_fc"]]

    # Advisory cost estimate so XLA doesn't over-serialize around the call.
    flops = (2 * T * B_pad * I * H                       # layer-0 projection
             + 2 * T * B_pad * H * H                     # layer-0 recurrent
             + (n_layers - 1) * T * 4 * B_pad * H * H    # layers >= 1 (2 dots)
             + 2 * B_pad * H * C_pad)                    # classifier
    transcendentals = T * n_layers * B_pad * H
    bytes_accessed = 4 * (sum(a.size for a in args) + B_pad * C_pad)

    vmem_spec = pl.BlockSpec(memory_space=pltpu.MemorySpace.VMEM)

    # No grid: one invocation, everything resident in VMEM (tiny problem).
    out_pad = pl.pallas_call(
        kernel,
        out_shape=jax.ShapeDtypeStruct((B_pad, C_pad), jnp.float32),
        in_specs=[vmem_spec] * len(args),
        out_specs=vmem_spec,
        cost_estimate=pl.CostEstimate(
            flops=flops, transcendentals=transcendentals,
            bytes_accessed=bytes_accessed),
    )(*args)
    return out_pad[:B, :n_class]


def init_params(key, input_size, n_class, hidden_n, n_layers):
    """Uniform(-1/sqrt(H), 1/sqrt(H)) init mimicking nn.RNN / nn.Linear."""
    H, I, C, L = hidden_n, input_size, n_class, n_layers
    C_pad = _round_up(C, 128)
    bound = 1.0 / (H ** 0.5)
    keys = iter(jax.random.split(key, 4 * L + 2))
    u = lambda shape: jax.random.uniform(
        next(keys), shape, jnp.float32, -bound, bound)

    w_ih0 = u((I, H))                       # transposed vs torch layout
    w_hh0 = u((H, H))
    b0 = u((1, H)) + u((1, H))              # b_ih + b_hh (always summed)

    w_ih_rest, w_hh_rest, b_rest = [], [], []
    for _ in range(L - 1):
        w_ih_rest.append(u((H, H)))
        w_hh_rest.append(u((H, H)))
        b_rest.append(u((1, H)) + u((1, H)))

    # Classifier pre-padded to 128 lanes once here (padded logits are exactly
    # zero and sliced off in the wrapper).
    w_fc = jnp.pad(u((H, C)), ((0, 0), (0, C_pad - C)))
    b_fc = jnp.pad(u((1, C)), ((0, 0), (0, C_pad - C)))

    params = {
        "w_ih0": w_ih0,
        "w_hh0": w_hh0,
        "b0": b0,
        "w_fc": w_fc,
        "b_fc": b_fc,
    }
    if L > 1:
        params["w_ih_rest"] = jnp.stack(w_ih_rest)   # (L-1, H, H)
        params["w_hh_rest"] = jnp.stack(w_hh_rest)   # (L-1, H, H)
        params["b_rest"] = jnp.stack(b_rest)         # (L-1, 1, H)
    return params


def rnn_model_ref(x, params, *, n_layers, hidden_n, n_class):
    """Plain-JAX reference matching torch nn.RNN(batch_first=True) + Linear."""
    B, T, I = x.shape
    H = hidden_n
    x_tm = jnp.transpose(x, (1, 0, 2))
    h = [jnp.zeros((B, H), jnp.float32) for _ in range(n_layers)]
    inp = h[0]
    for t in range(T):
        inp = jnp.tanh(
            x_tm[t] @ params["w_ih0"] + h[0] @ params["w_hh0"] + params["b0"])
        h[0] = inp
        for l in range(1, n_layers):
            inp = jnp.tanh(
                inp @ params["w_ih_rest"][l - 1]
                + h[l] @ params["w_hh_rest"][l - 1]
                + params["b_rest"][l - 1])
            h[l] = inp
    out = inp @ params["w_fc"] + params["b_fc"]
    return out[:, :n_class]


if __name__ == "__main__":
    B, T = 2, 8              # batch, sequence length
    input_size = 16
    hidden_n = 32
    n_layers = 2
    n_class = 5

    key = jax.random.PRNGKey(0)
    k_x, k_p = jax.random.split(key)
    x = jax.random.normal(k_x, (B, T, input_size), jnp.float32)
    params = init_params(k_p, input_size, n_class, hidden_n, n_layers)

    out = rnn_model_forward(x, params, n_layers=n_layers,
                            hidden_n=hidden_n, n_class=n_class)
    out = jax.block_until_ready(out)

    ref = rnn_model_ref(x, params, n_layers=n_layers, hidden_n=hidden_n,
                        n_class=n_class)
    assert out.shape == (B, n_class)
    assert jnp.allclose(out, ref, atol=1e-4, rtol=1e-4), (out, ref)
    print("KERNEL_OK")
</pallas_src>

<mosaic_0001>
module attributes {stable_mosaic.version = 11 : i64} {
  func.func @_rnn_fc_kernel(%arg0: memref<64x16xf32, #tpu.memory_space<vmem>>, %arg1: memref<16x32xf32, #tpu.memory_space<vmem>>, %arg2: memref<32x32xf32, #tpu.memory_space<vmem>>, %arg3: memref<1x32xf32, #tpu.memory_space<vmem>>, %arg4: memref<1x32x32xf32, #tpu.memory_space<vmem>>, %arg5: memref<1x32x32xf32, #tpu.memory_space<vmem>>, %arg6: memref<1x1x32xf32, #tpu.memory_space<vmem>>, %arg7: memref<32x128xf32, #tpu.memory_space<vmem>>, %arg8: memref<1x128xf32, #tpu.memory_space<vmem>>, %arg9: memref<8x128xf32, #tpu.memory_space<vmem>>) attributes {dimension_semantics = [], scalar_prefetch = 0 : i64, scratch_operands = 0 : i64, tpu.core_type = #tpu.core_type<tc>} {
    %c0 = arith.constant 0 : index
    %c0_0 = arith.constant 0 : index
    %0 = vector.load %arg0[%c0, %c0_0] : memref<64x16xf32, #tpu.memory_space<vmem>>, vector<64x16xf32>
    %c0_1 = arith.constant 0 : index
    %c0_2 = arith.constant 0 : index
    %1 = vector.load %arg1[%c0_1, %c0_2] : memref<16x32xf32, #tpu.memory_space<vmem>>, vector<16x32xf32>
    %cst = arith.constant dense<0.000000e+00> : vector<64x32xf32>
    %2 = tpu.matmul %0, %1, %cst {dimension_numbers = #tpu.dot_dimension_numbers<[1], [0], [0], [1], [0, 0, 1, 1], [], []>} : vector<64x16xf32>, vector<16x32xf32>, vector<64x32xf32> -> vector<64x32xf32>
    %c0_3 = arith.constant 0 : index
    %c0_4 = arith.constant 0 : index
    %3 = vector.load %arg3[%c0_3, %c0_4] : memref<1x32xf32, #tpu.memory_space<vmem>>, vector<1x32xf32>
    %4 = vector.broadcast %3 : vector<1x32xf32> to vector<64x32xf32>
    %5 = arith.addf %2, %4 : vector<64x32xf32>
    %c0_5 = arith.constant 0 : index
    %c0_6 = arith.constant 0 : index
    %6 = vector.load %arg2[%c0_5, %c0_6] : memref<32x32xf32, #tpu.memory_space<vmem>>, vector<32x32xf32>
    %c0_7 = arith.constant 0 : index
    %c0_8 = arith.constant 0 : index
    %c0_9 = arith.constant 0 : index
    %7 = vector.load %arg4[%c0_7, %c0_8, %c0_9] : memref<1x32x32xf32, #tpu.memory_space<vmem>>, vector<1x32x32xf32>
    %8 = vector.shape_cast %7 : vector<1x32x32xf32> to vector<32x32xf32>
    %c0_10 = arith.constant 0 : index
    %c0_11 = arith.constant 0 : index
    %c0_12 = arith.constant 0 : index
    %9 = vector.load %arg5[%c0_10, %c0_11, %c0_12] : memref<1x32x32xf32, #tpu.memory_space<vmem>>, vector<1x32x32xf32>
    %10 = vector.shape_cast %9 : vector<1x32x32xf32> to vector<32x32xf32>
    %c0_13 = arith.constant 0 : index
    %c0_14 = arith.constant 0 : index
    %c0_15 = arith.constant 0 : index
    %11 = vector.load %arg6[%c0_13, %c0_14, %c0_15] : memref<1x1x32xf32, #tpu.memory_space<vmem>>, vector<1x1x32xf32>
    %12 = vector.shape_cast %11 : vector<1x1x32xf32> to vector<1x32xf32>
    %c0_16 = arith.constant 0 : index
    %c0_17 = arith.constant 0 : index
    %13 = vector.load %arg7[%c0_16, %c0_17] : memref<32x128xf32, #tpu.memory_space<vmem>>, vector<32x128xf32>
    %c0_18 = arith.constant 0 : index
    %c0_19 = arith.constant 0 : index
    %14 = vector.load %arg8[%c0_18, %c0_19] : memref<1x128xf32, #tpu.memory_space<vmem>>, vector<1x128xf32>
    %cst_20 = arith.constant 0.000000e+00 : f32
    %15 = vector.broadcast %cst_20 : f32 to vector<8x32xf32>
    %cst_21 = arith.constant 0.000000e+00 : f32
    %16 = vector.broadcast %cst_21 : f32 to vector<8x32xf32>
    %17 = vector.extract_strided_slice %5 {offsets = [0, 0], sizes = [8, 32], strides = [1, 1]} : vector<64x32xf32> to vector<8x32xf32>
    %cst_22 = arith.constant dense<0.000000e+00> : vector<8x32xf32>
    %18 = tpu.matmul %15, %6, %cst_22 {dimension_numbers = #tpu.dot_dimension_numbers<[1], [0], [0], [1], [0, 0, 1, 1], [], []>} : vector<8x32xf32>, vector<32x32xf32>, vector<8x32xf32> -> vector<8x32xf32>
    %19 = arith.addf %17, %18 : vector<8x32xf32>
    %20 = math.tanh %19 : vector<8x32xf32>
    %21 = vector.extract_strided_slice %5 {offsets = [8, 0], sizes = [8, 32], strides = [1, 1]} : vector<64x32xf32> to vector<8x32xf32>
    %cst_23 = arith.constant dense<0.000000e+00> : vector<8x32xf32>
    %22 = tpu.matmul %20, %6, %cst_23 {dimension_numbers = #tpu.dot_dimension_numbers<[1], [0], [0], [1], [0, 0, 1, 1], [], []>} : vector<8x32xf32>, vector<32x32xf32>, vector<8x32xf32> -> vector<8x32xf32>
    %23 = arith.addf %21, %22 : vector<8x32xf32>
    %24 = math.tanh %23 : vector<8x32xf32>
    %cst_24 = arith.constant dense<0.000000e+00> : vector<8x32xf32>
    %25 = tpu.matmul %20, %8, %cst_24 {dimension_numbers = #tpu.dot_dimension_numbers<[1], [0], [0], [1], [0, 0, 1, 1], [], []>} : vector<8x32xf32>, vector<32x32xf32>, vector<8x32xf32> -> vector<8x32xf32>
    %cst_25 = arith.constant dense<0.000000e+00> : vector<8x32xf32>
    %26 = tpu.matmul %16, %10, %cst_25 {dimension_numbers = #tpu.dot_dimension_numbers<[1], [0], [0], [1], [0, 0, 1, 1], [], []>} : vector<8x32xf32>, vector<32x32xf32>, vector<8x32xf32> -> vector<8x32xf32>
    %27 = arith.addf %25, %26 : vector<8x32xf32>
    %28 = vector.broadcast %12 : vector<1x32xf32> to vector<8x32xf32>
    %29 = arith.addf %27, %28 : vector<8x32xf32>
    %30 = math.tanh %29 : vector<8x32xf32>
    %31 = vector.extract_strided_slice %5 {offsets = [16, 0], sizes = [8, 32], strides = [1, 1]} : vector<64x32xf32> to vector<8x32xf32>
    %cst_26 = arith.constant dense<0.000000e+00> : vector<8x32xf32>
    %32 = tpu.matmul %24, %6, %cst_26 {dimension_numbers = #tpu.dot_dimension_numbers<[1], [0], [0], [1], [0, 0, 1, 1], [], []>} : vector<8x32xf32>, vector<32x32xf32>, vector<8x32xf32> -> vector<8x32xf32>
    %33 = arith.addf %31, %32 : vector<8x32xf32>
    %34 = math.tanh %33 : vector<8x32xf32>
    %cst_27 = arith.constant dense<0.000000e+00> : vector<8x32xf32>
    %35 = tpu.matmul %24, %8, %cst_27 {dimension_numbers = #tpu.dot_dimension_numbers<[1], [0], [0], [1], [0, 0, 1, 1], [], []>} : vector<8x32xf32>, vector<32x32xf32>, vector<8x32xf32> -> vector<8x32xf32>
    %cst_28 = arith.constant dense<0.000000e+00> : vector<8x32xf32>
    %36 = tpu.matmul %30, %10, %cst_28 {dimension_numbers = #tpu.dot_dimension_numbers<[1], [0], [0], [1], [0, 0, 1, 1], [], []>} : vector<8x32xf32>, vector<32x32xf32>, vector<8x32xf32> -> vector<8x32xf32>
    %37 = arith.addf %35, %36 : vector<8x32xf32>
    %38 = vector.broadcast %12 : vector<1x32xf32> to vector<8x32xf32>
    %39 = arith.addf %37, %38 : vector<8x32xf32>
    %40 = math.tanh %39 : vector<8x32xf32>
    %41 = vector.extract_strided_slice %5 {offsets = [24, 0], sizes = [8, 32], strides = [1, 1]} : vector<64x32xf32> to vector<8x32xf32>
    %cst_29 = arith.constant dense<0.000000e+00> : vector<8x32xf32>
    %42 = tpu.matmul %34, %6, %cst_29 {dimension_numbers = #tpu.dot_dimension_numbers<[1], [0], [0], [1], [0, 0, 1, 1], [], []>} : vector<8x32xf32>, vector<32x32xf32>, vector<8x32xf32> -> vector<8x32xf32>
    %43 = arith.addf %41, %42 : vector<8x32xf32>
    %44 = math.tanh %43 : vector<8x32xf32>
    %cst_30 = arith.constant dense<0.000000e+00> : vector<8x32xf32>
    %45 = tpu.matmul %34, %8, %cst_30 {dimension_numbers = #tpu.dot_dimension_numbers<[1], [0], [0], [1], [0, 0, 1, 1], [], []>} : vector<8x32xf32>, vector<32x32xf32>, vector<8x32xf32> -> vector<8x32xf32>
    %cst_31 = arith.constant dense<0.000000e+00> : vector<8x32xf32>
    %46 = tpu.matmul %40, %10, %cst_31 {dimension_numbers = #tpu.dot_dimension_numbers<[1], [0], [0], [1], [0, 0, 1, 1], [], []>} : vector<8x32xf32>, vector<32x32xf32>, vector<8x32xf32> -> vector<8x32xf32>
    %47 = arith.addf %45, %46 : vector<8x32xf32>
    %48 = vector.broadcast %12 : vector<1x32xf32> to vector<8x32xf32>
    %49 = arith.addf %47, %48 : vector<8x32xf32>
    %50 = math.tanh %49 : vector<8x32xf32>
    %51 = vector.extract_strided_slice %5 {offsets = [32, 0], sizes = [8, 32], strides = [1, 1]} : vector<64x32xf32> to vector<8x32xf32>
    %cst_32 = arith.constant dense<0.000000e+00> : vector<8x32xf32>
    %52 = tpu.matmul %44, %6, %cst_32 {dimension_numbers = #tpu.dot_dimension_numbers<[1], [0], [0], [1], [0, 0, 1, 1], [], []>} : vector<8x32xf32>, vector<32x32xf32>, vector<8x32xf32> -> vector<8x32xf32>
    %53 = arith.addf %51, %52 : vector<8x32xf32>
    %54 = math.tanh %53 : vector<8x32xf32>
    %cst_33 = arith.constant dense<0.000000e+00> : vector<8x32xf32>
    %55 = tpu.matmul %44, %8, %cst_33 {dimension_numbers = #tpu.dot_dimension_numbers<[1], [0], [0], [1], [0, 0, 1, 1], [], []>} : vector<8x32xf32>, vector<32x32xf32>, vector<8x32xf32> -> vector<8x32xf32>
    %cst_34 = arith.constant dense<0.000000e+00> : vector<8x32xf32>
    %56 = tpu.matmul %50, %10, %cst_34 {dimension_numbers = #tpu.dot_dimension_numbers<[1], [0], [0], [1], [0, 0, 1, 1], [], []>} : vector<8x32xf32>, vector<32x32xf32>, vector<8x32xf32> -> vector<8x32xf32>
    %57 = arith.addf %55, %56 : vector<8x32xf32>
    %58 = vector.broadcast %12 : vector<1x32xf32> to vector<8x32xf32>
    %59 = arith.addf %57, %58 : vector<8x32xf32>
    %60 = math.tanh %59 : vector<8x32xf32>
    %61 = vector.extract_strided_slice %5 {offsets = [40, 0], sizes = [8, 32], strides = [1, 1]} : vector<64x32xf32> to vector<8x32xf32>
    %cst_35 = arith.constant dense<0.000000e+00> : vector<8x32xf32>
    %62 = tpu.matmul %54, %6, %cst_35 {dimension_numbers = #tpu.dot_dimension_numbers<[1], [0], [0], [1], [0, 0, 1, 1], [], []>} : vector<8x32xf32>, vector<32x32xf32>, vector<8x32xf32> -> vector<8x32xf32>
    %63 = arith.addf %61, %62 : vector<8x32xf32>
    %64 = math.tanh %63 : vector<8x32xf32>
    %cst_36 = arith.constant dense<0.000000e+00> : vector<8x32xf32>
    %65 = tpu.matmul %54, %8, %cst_36 {dimension_numbers = #tpu.dot_dimension_numbers<[1], [0], [0], [1], [0, 0, 1, 1], [], []>} : vector<8x32xf32>, vector<32x32xf32>, vector<8x32xf32> -> vector<8x32xf32>
    %cst_37 = arith.constant dense<0.000000e+00> : vector<8x32xf32>
    %66 = tpu.matmul %60, %10, %cst_37 {dimension_numbers = #tpu.dot_dimension_numbers<[1], [0], [0], [1], [0, 0, 1, 1], [], []>} : vector<8x32xf32>, vector<32x32xf32>, vector<8x32xf32> -> vector<8x32xf32>
    %67 = arith.addf %65, %66 : vector<8x32xf32>
    %68 = vector.broadcast %12 : vector<1x32xf32> to vector<8x32xf32>
    %69 = arith.addf %67, %68 : vector<8x32xf32>
    %70 = math.tanh %69 : vector<8x32xf32>
    %71 = vector.extract_strided_slice %5 {offsets = [48, 0], sizes = [8, 32], strides = [1, 1]} : vector<64x32xf32> to vector<8x32xf32>
    %cst_38 = arith.constant dense<0.000000e+00> : vector<8x32xf32>
    %72 = tpu.matmul %64, %6, %cst_38 {dimension_numbers = #tpu.dot_dimension_numbers<[1], [0], [0], [1], [0, 0, 1, 1], [], []>} : vector<8x32xf32>, vector<32x32xf32>, vector<8x32xf32> -> vector<8x32xf32>
    %73 = arith.addf %71, %72 : vector<8x32xf32>
    %74 = math.tanh %73 : vector<8x32xf32>
    %cst_39 = arith.constant dense<0.000000e+00> : vector<8x32xf32>
    %75 = tpu.matmul %64, %8, %cst_39 {dimension_numbers = #tpu.dot_dimension_numbers<[1], [0], [0], [1], [0, 0, 1, 1], [], []>} : vector<8x32xf32>, vector<32x32xf32>, vector<8x32xf32> -> vector<8x32xf32>
    %cst_40 = arith.constant dense<0.000000e+00> : vector<8x32xf32>
    %76 = tpu.matmul %70, %10, %cst_40 {dimension_numbers = #tpu.dot_dimension_numbers<[1], [0], [0], [1], [0, 0, 1, 1], [], []>} : vector<8x32xf32>, vector<32x32xf32>, vector<8x32xf32> -> vector<8x32xf32>
    %77 = arith.addf %75, %76 : vector<8x32xf32>
    %78 = vector.broadcast %12 : vector<1x32xf32> to vector<8x32xf32>
    %79 = arith.addf %77, %78 : vector<8x32xf32>
    %80 = math.tanh %79 : vector<8x32xf32>
    %81 = vector.extract_strided_slice %5 {offsets = [56, 0], sizes = [8, 32], strides = [1, 1]} : vector<64x32xf32> to vector<8x32xf32>
    %cst_41 = arith.constant dense<0.000000e+00> : vector<8x32xf32>
    %82 = tpu.matmul %74, %6, %cst_41 {dimension_numbers = #tpu.dot_dimension_numbers<[1], [0], [0], [1], [0, 0, 1, 1], [], []>} : vector<8x32xf32>, vector<32x32xf32>, vector<8x32xf32> -> vector<8x32xf32>
    %83 = arith.addf %81, %82 : vector<8x32xf32>
    %84 = math.tanh %83 : vector<8x32xf32>
    %cst_42 = arith.constant dense<0.000000e+00> : vector<8x32xf32>
    %85 = tpu.matmul %74, %8, %cst_42 {dimension_numbers = #tpu.dot_dimension_numbers<[1], [0], [0], [1], [0, 0, 1, 1], [], []>} : vector<8x32xf32>, vector<32x32xf32>, vector<8x32xf32> -> vector<8x32xf32>
    %cst_43 = arith.constant dense<0.000000e+00> : vector<8x32xf32>
    %86 = tpu.matmul %80, %10, %cst_43 {dimension_numbers = #tpu.dot_dimension_numbers<[1], [0], [0], [1], [0, 0, 1, 1], [], []>} : vector<8x32xf32>, vector<32x32xf32>, vector<8x32xf32> -> vector<8x32xf32>
    %87 = arith.addf %85, %86 : vector<8x32xf32>
    %88 = vector.broadcast %12 : vector<1x32xf32> to vector<8x32xf32>
    %89 = arith.addf %87, %88 : vector<8x32xf32>
    %90 = math.tanh %89 : vector<8x32xf32>
    %cst_44 = arith.constant dense<0.000000e+00> : vector<8x32xf32>
    %91 = tpu.matmul %84, %8, %cst_44 {dimension_numbers = #tpu.dot_dimension_numbers<[1], [0], [0], [1], [0, 0, 1, 1], [], []>} : vector<8x32xf32>, vector<32x32xf32>, vector<8x32xf32> -> vector<8x32xf32>
    %cst_45 = arith.constant dense<0.000000e+00> : vector<8x32xf32>
    %92 = tpu.matmul %90, %10, %cst_45 {dimension_numbers = #tpu.dot_dimension_numbers<[1], [0], [0], [1], [0, 0, 1, 1], [], []>} : vector<8x32xf32>, vector<32x32xf32>, vector<8x32xf32> -> vector<8x32xf32>
    %93 = arith.addf %91, %92 : vector<8x32xf32>
    %94 = vector.broadcast %12 : vector<1x32xf32> to vector<8x32xf32>
    %95 = arith.addf %93, %94 : vector<8x32xf32>
    %96 = math.tanh %95 : vector<8x32xf32>
    %cst_46 = arith.constant dense<0.000000e+00> : vector<8x128xf32>
    %97 = tpu.matmul %96, %13, %cst_46 {dimension_numbers = #tpu.dot_dimension_numbers<[1], [0], [0], [1], [0, 0, 1, 1], [], []>} : vector<8x32xf32>, vector<32x128xf32>, vector<8x128xf32> -> vector<8x128xf32>
    %98 = vector.broadcast %14 : vector<1x128xf32> to vector<8x128xf32>
    %99 = arith.addf %97, %98 : vector<8x128xf32>
    %c0_47 = arith.constant 0 : index
    %c0_48 = arith.constant 0 : index
    %100 = vector.load %arg9[%c0_47, %c0_48] : memref<8x128xf32, #tpu.memory_space<vmem>>, vector<8x128xf32>
    tpu.vector_store %arg9[%c0_47, %c0_48], %99 {strides = array<i32>} : memref<8x128xf32, #tpu.memory_space<vmem>>, vector<8x128xf32>,
    return
  }
}

</mosaic_0001>

<bundles_post_ra>
// kernel: rnn_model_forward.1
= control target key start
LH: loop header
LB: loop body
LE: loop exit
PB: predicated region body
PF: predicated region fallthrough
CT: control target
= control target key end

     0   :  { %14 = vsyncpa [#allocation3], 0  ;;  %s1187_s0 = inlined_call_operand.vmem [shape: f32[64,16], index: 0, kind: input, shape index: {}]   ;;  %s1188_s1 = inlined_call_operand.vmem [shape: f32[16,32], index: 1, kind: input, shape index: {}]   ;;  %s1189_s2 = inlined_call_operand.vmem [shape: f32[32,32], index: 2, kind: input, shape index: {}]   ;;  %s1190_s3 = inlined_call_operand.vmem [shape: f32[1,32], index: 3, kind: input, shape index: {}]   ;;  %s1191_s4 = inlined_call_operand.vmem [shape: f32[1,32,32], index: 4, kind: input, shape index: {}]   ;;  %s1192_s5 = inlined_call_operand.vmem [shape: f32[1,32,32], index: 5, kind: input, shape index: {}]   ;;  %s1193_s6 = inlined_call_operand.vmem [shape: f32[1,1,32], index: 6, kind: input, shape index: {}]   ;;  %s1194_s7 = inlined_call_operand.hbm [shape: f32[32,128], index: 7, kind: input, shape index: {}]   ;;  %s1195_s8 = inlined_call_operand.hbm [shape: f32[1,128], index: 8, kind: input, shape index: {}]   ;;  %s1196_s9 = inlined_call_operand.vmem [shape: f32[8,128], index: 9, kind: output, shape index: {}]  }
   0x1   :  { %s34_s11 = sshll.u32 %s1194_s7, 4  ;;  %s35_s11 = int_to_ptr.hbm [resolvable:$true] %s34_s11 }
   0x2   :  { %15 = vsyncpa [#allocation5], 0  ;;  %s880_s12 = smov [#allocation2]   ;;  %s48_s16 = sshll.u32 %s1195_s8, 4  ;;  %s49_s16 = int_to_ptr.hbm [resolvable:$true] %s48_s16 }
   0x3   :  { %s36_s13 = sshll.u32 %s880_s12, 4  ;;  %s881_s17 = smov 128   ;;  %s37_s13 = int_to_ptr.vmem [resolvable:$true] %s36_s13 }
   0x4   :  { %s882_s18 = smov 8   ;;  %s883_s19 = smov [#allocation4]  }
   0x5   :  { %42 = dma.hbm_to_vmem [thread:$0]  %s35_s11, 512, %s37_s13, [#allocation3], %s881_s17, %s881_s17, %s882_s18  }
   0x6   :  { %s50_s20 = sshll.u32 %s883_s19, 4  ;;  %s51_s20 = int_to_ptr.vmem [resolvable:$true] %s50_s20 }
   0x7   :  { %53 = dma.hbm_to_vmem [thread:$0]  %s49_s16, 16, %s51_s20, [#allocation5]  }
   0x8   :  { %876 = dma.done.wait [#allocation3], 512  }
   0x9   :  { %877 = vsyncadd [#allocation3], 4294966784 }
   0xa   :  { %878 = dma.done.wait [#allocation5], 16  }
   0xb   :  { %879 = vsyncadd [#allocation5], 4294967280  ;;  %v944_v0 = vld [vmem:[%s1189_s2 + $0x18] sm:$0xff]  ;;  %v71_v1 = vld [vmem:[%s1188_s1 + $0x8] sm:$0xff]  ;;  %vm76_vm0 = vcmask 130048   ;;  %v884_v8 = vmov 0.0  }
   0xc   :  { %v952_v2 = vld [vmem:[%s1189_s2 + $0x10] sm:$0xff]  ;;  %176 = vmatpush.msra.mxu1 %v944_v0  ;;  %115 = vmatpush.msra.mxu0 %v71_v1  ;;  %v70_v3 = vld [vmem:[%s1188_s1] sm:$0xff]  ;;  %v964_v5 = vld [vmem:[%s1189_s2 + $0x8] sm:$0xff]  ;;  %vm160_vm1 = vcmask 261120  }
   0xd   :  { %v62_v4 = vld [vmem:[%s1187_s0] sm:$0xff]  ;;  %v969_v6 = vld [vmem:[%s1192_s5 + $0x18] sm:$0xff]  ;;  %201 = vmatpush.msra.mxu2 %v944_v0  ;;  %v992_v9 = vld [vmem:[%s1192_s5 + $0x10] sm:$0xff] }
   0xe   :  { %177 = vmatpush.msra.mxu1 %v952_v2  ;;  %116 = vmatpush.msra.mxu0 %v70_v3  ;;  %v977_v7 = vld [vmem:[%s1189_s2] sm:$0xff]  ;;  %v998_v10 = vld [vmem:[%s1192_s5 + $0x8] sm:$0xff]  ;;  %v1004_v11 = vld [vmem:[%s1191_s4 + $0x18] sm:$0xff] }
   0xf   :  { %757 = vmatmul.msk.f32.vlgmr.msra.gmra.mxu0 %vm76_vm0, %v62_v4  ;;  %223 = vmatpush.msra.mxu3 %v969_v6  ;;  %v1009_v12 = vld [vmem:[%s1192_s5] sm:$0xff]  ;;  %v1016_v13 = vld [vmem:[%s1191_s4 + $0x10] sm:$0xff]  ;;  %v1021_v14 = vld [vmem:[%s1191_s4 + $0x8] sm:$0xff] }
  0x10   :  { %178 = vmatpush.msra.mxu1 %v964_v5  ;;  %202 = vmatpush.msra.mxu2 %v952_v2  ;;  %v1028_v15 = vld [vmem:[%s1191_s4] sm:$0xff]  ;;  %v63_v16 = vld [vmem:[%s1187_s0 + $0x8] sm:$0xff]  ;;  %v64_v23 = vld [vmem:[%s1187_s0 + $0x10] sm:$0xff] }
  0x11   :  { %224 = vmatpush.msra.mxu3 %v992_v9  ;;  %v1050_v17 = vld [vmem:[%s1190_s3] ss:$0 sm:$0xff]  ;;  %v65_v35 = vld [vmem:[%s1187_s0 + $0x18] sm:$0xff]  ;;  %v67_v57 = vld [vmem:[%s1187_s0 + $0x28] sm:$0xff] }
  0x12   :  { %179 = vmatpush.msra.mxu1 %v977_v7  ;;  %203 = vmatpush.msra.mxu2 %v964_v5  ;;  %v1070_v25 = vld [vmem:[%s1193_s6] ss:$0 sm:$0xff] }
  0x13   :  { %180 = vmatmul.f32.vlgmr.msra.gmra.mxu1 %v884_v8  ;;  %225 = vmatpush.msra.mxu3 %v998_v10  ;;  %v66_v46 = vld [vmem:[%s1187_s0 + $0x20] sm:$0xff] }
  0x14   :  { %204 = vmatpush.msra.mxu2 %v977_v7  ;;  %243 = vmatpush.msrb.mxu1 %v1004_v11 }
  0x15   :  { %226 = vmatpush.msra.mxu3 %v1009_v12 }
  0x16   :  { %271 = vmatpush.msrb.mxu2 %v944_v0  ;;  %227 = vmatmul.f32.vlgmr.msra.gmra.mxu3 %v884_v8 }
  0x17   :  { %244 = vmatpush.msrb.mxu1 %v1016_v13  ;;  %296 = vmatpush.msrb.mxu3 %v969_v6 }
  0x18   :  { %272 = vmatpush.msrb.mxu2 %v952_v2  ;;  %758 = vmatmul.msk.f32.gmra.mxu0 %vm76_vm0, %v63_v16 }
  0x19   :  { %245 = vmatpush.msrb.mxu1 %v1021_v14  ;;  %297 = vmatpush.msrb.mxu3 %v992_v9 }
  0x1a   :  { %273 = vmatpush.msrb.mxu2 %v964_v5 }
  0x1b   :  { %246 = vmatpush.msrb.mxu1 %v1028_v15  ;;  %298 = vmatpush.msrb.mxu3 %v998_v10 }
  0x1c   :  { %274 = vmatpush.msrb.mxu2 %v977_v7 }
  0x1d   :  { %316 = vmatpush.msra.mxu1 %v1004_v11  ;;  %299 = vmatpush.msrb.mxu3 %v1009_v12 }
  0x1f   :  { %317 = vmatpush.msra.mxu1 %v1016_v13  ;;  %366 = vmatpush.msra.mxu3 %v969_v6 }
  0x20   :  { %759 = vmatmul.msk.f32.gmra.mxu0 %vm76_vm0, %v64_v23 }
  0x21   :  { %318 = vmatpush.msra.mxu1 %v1021_v14  ;;  %367 = vmatpush.msra.mxu3 %v992_v9 }
  0x23   :  { %319 = vmatpush.msra.mxu1 %v1028_v15  ;;  %368 = vmatpush.msra.mxu3 %v998_v10 }
  0x25   :  { %369 = vmatpush.msra.mxu3 %v1009_v12 }
  0x28   :  { %760 = vmatmul.msk.f32.gmra.mxu0 %vm76_vm0, %v65_v35 }
  0x30   :  { %761 = vmatmul.msk.f32.gmra.mxu0 %vm76_vm0, %v66_v46  ;;  %v795_v46 = vld [vmem:[#allocation4] ss:$0 sm:$0xff] }
  0x38   :  { %762 = vmatmul.msk.f32.gmra.mxu0 %vm76_vm0, %v67_v57 }
  0x8c   :  { %v118_v18 = vpop.f32.mrf.mxu0 }
  0x8d   :  { %v119_v19 = vadd.f32 %v1050_v17, %v118_v18 }
  0x90   :  { %v181_v20 = vpop.f32.mrf.mxu1 }
  0x91   :  { %v184_v21 = vadd.f32 %v181_v20, %v119_v19 }
  0x93   :  { %796 = vtanh.f32 %v184_v21 }
  0x95   :  { %v121_v27 = vpop.f32.mrf.mxu0 }
  0x96   :  { %v122_v30 = vadd.f32 %v1050_v17, %v121_v27 }
  0x99   :  { %v797_v22 = vpop.eup %796  ;;  %v228_v24 = vpop.f32.mrf.mxu3 }
  0x9a   :  { %765 = vmatmul.msk.f32.vlgmr.msra.gmra.mxu2 %vm160_vm1, %v797_v22  ;;  %766 = vmatmul.msk.f32.vlgmr.msrb.gmra.mxu1 %vm160_vm1, %v797_v22 }
  0x9b   :  { %341 = vmatpush.msra.mxu2 %v944_v0  ;;  %386 = vmatpush.msrb.mxu1 %v1004_v11 }
  0x9d   :  { %342 = vmatpush.msra.mxu2 %v952_v2  ;;  %387 = vmatpush.msrb.mxu1 %v1016_v13  ;;  %v124_v36 = vpop.f32.mrf.mxu0 }
  0x9e   :  { %v125_v40 = vadd.f32 %v1050_v17, %v124_v36 }
  0x9f   :  { %343 = vmatpush.msra.mxu2 %v964_v5  ;;  %388 = vmatpush.msrb.mxu1 %v1021_v14 }
  0xa1   :  { %344 = vmatpush.msra.mxu2 %v977_v7  ;;  %389 = vmatpush.msrb.mxu1 %v1028_v15 }
  0xa5   :  { %v127_v47 = vpop.f32.mrf.mxu0 }
  0xa6   :  { %v128_v48 = vadd.f32 %v1050_v17, %v127_v47 }
  0xad   :  { %v130_v58 = vpop.f32.mrf.mxu0 }
  0xae   :  { %v131_v59 = vadd.f32 %v1050_v17, %v130_v58 }
 0x117   :  { %v248_v26 = vpop.f32.mrf.mxu1 }
 0x118   :  { %v249_v28 = vadd.f32 %v248_v26, %v228_v24 }
 0x11a   :  { %v254_v29 = vadd.f32 %v1070_v25, %v249_v28  ;;  %v158_v28 = vld [vmem:[#allocation2 + $0x18] sm:$0xff] }
 0x11b   :  { %742 = vmatpush.msrb.mxu0 %v158_v28 }
 0x11c   :  { %798 = vtanh.f32 %v254_v29  ;;  %v157_v29 = vld [vmem:[#allocation2 + $0x10] sm:$0xff] }
 0x11d   :  { %v206_v31 = vpop.f32.mrf.mxu2  ;;  %743 = vmatpush.msrb.mxu0 %v157_v29 }
 0x11e   :  { %v209_v32 = vadd.f32 %v206_v31, %v122_v30  ;;  %v156_v30 = vld [vmem:[#allocation2 + $0x8] sm:$0xff] }
 0x11f   :  { %744 = vmatpush.msrb.mxu0 %v156_v30 }
 0x120   :  { %800 = vtanh.f32 %v209_v32 }
 0x122   :  { %v799_v33 = vpop.eup %798 }
 0x123   :  { %768 = vmatmul.msk.f32.vlgmr.msrb.gmra.mxu3 %vm160_vm1, %v799_v33 }
 0x124   :  { %436 = vmatpush.msrb.mxu3 %v969_v6 }
 0x126   :  { %v801_v34 = vpop.eup %800  ;;  %437 = vmatpush.msrb.mxu3 %v992_v9 }
 0x127   :  { %767 = vmatmul.msk.f32.vlgmr.msrb.gmra.mxu2 %vm160_vm1, %v801_v34  ;;  %769 = vmatmul.msk.f32.vlgmr.msra.gmra.mxu1 %vm160_vm1, %v801_v34 }
 0x128   :  { %411 = vmatpush.msrb.mxu2 %v944_v0  ;;  %456 = vmatpush.msra.mxu1 %v1004_v11 }
 0x129   :  { %438 = vmatpush.msrb.mxu3 %v998_v10 }
 0x12a   :  { %412 = vmatpush.msrb.mxu2 %v952_v2  ;;  %457 = vmatpush.msra.mxu1 %v1016_v13 }
 0x12b   :  { %439 = vmatpush.msrb.mxu3 %v1009_v12 }
 0x12c   :  { %413 = vmatpush.msrb.mxu2 %v964_v5  ;;  %458 = vmatpush.msra.mxu1 %v1021_v14 }
 0x12e   :  { %414 = vmatpush.msrb.mxu2 %v977_v7  ;;  %459 = vmatpush.msra.mxu1 %v1028_v15 }
 0x1a4   :  { %v321_v37 = vpop.f32.mrf.mxu1 }
 0x1a6   :  { %v301_v38 = vpop.f32.mrf.mxu3 }
 0x1a7   :  { %v322_v39 = vadd.f32 %v321_v37, %v301_v38 }
 0x1a9   :  { %v324_v41 = vadd.f32 %v1070_v25, %v322_v39 }
 0x1aa   :  { %v276_v42 = vpop.f32.mrf.mxu2 }
 0x1ab   :  { %802 = vtanh.f32 %v324_v41  ;;  %v279_v43 = vadd.f32 %v276_v42, %v125_v40  ;;  %v155_v41 = vld [vmem:[#allocation2] sm:$0xff] }
 0x1ac   :  { %745 = vmatpush.msrb.mxu0 %v155_v41 }
 0x1ad   :  { %804 = vtanh.f32 %v279_v43 }
 0x1b1   :  { %v803_v44 = vpop.eup %802 }
 0x1b2   :  { %771 = vmatmul.msk.f32.vlgmr.msra.gmra.mxu3 %vm160_vm1, %v803_v44 }
 0x1b3   :  { %v805_v45 = vpop.eup %804  ;;  %506 = vmatpush.msra.mxu3 %v969_v6 }
 0x1b4   :  { %770 = vmatmul.msk.f32.vlgmr.msra.gmra.mxu2 %vm160_vm1, %v805_v45  ;;  %772 = vmatmul.msk.f32.vlgmr.msrb.gmra.mxu1 %vm160_vm1, %v805_v45 }
 0x1b5   :  { %481 = vmatpush.msra.mxu2 %v944_v0  ;;  %526 = vmatpush.msrb.mxu1 %v1004_v11 }
 0x1b6   :  { %507 = vmatpush.msra.mxu3 %v992_v9 }
 0x1b7   :  { %482 = vmatpush.msra.mxu2 %v952_v2  ;;  %527 = vmatpush.msrb.mxu1 %v1016_v13 }
 0x1b8   :  { %508 = vmatpush.msra.mxu3 %v998_v10 }
 0x1b9   :  { %483 = vmatpush.msra.mxu2 %v964_v5  ;;  %528 = vmatpush.msrb.mxu1 %v1021_v14 }
 0x1ba   :  { %509 = vmatpush.msra.mxu3 %v1009_v12 }
 0x1bb   :  { %484 = vmatpush.msra.mxu2 %v977_v7  ;;  %529 = vmatpush.msrb.mxu1 %v1028_v15 }
 0x231   :  { %v391_v49 = vpop.f32.mrf.mxu1 }
 0x235   :  { %v371_v50 = vpop.f32.mrf.mxu3 }
 0x236   :  { %v392_v51 = vadd.f32 %v391_v49, %v371_v50 }
 0x237   :  { %v346_v52 = vpop.f32.mrf.mxu2 }
 0x238   :  { %v394_v53 = vadd.f32 %v1070_v25, %v392_v51  ;;  %v349_v54 = vadd.f32 %v346_v52, %v128_v48 }
 0x23a   :  { %806 = vtanh.f32 %v394_v53 }
 0x23b   :  { %808 = vtanh.f32 %v349_v54 }
 0x240   :  { %v807_v55 = vpop.eup %806 }
 0x241   :  { %v809_v56 = vpop.eup %808  ;;  %774 = vmatmul.msk.f32.vlgmr.msrb.gmra.mxu3 %vm160_vm1, %v807_v55 }
 0x242   :  { %773 = vmatmul.msk.f32.vlgmr.msrb.gmra.mxu2 %vm160_vm1, %v809_v56  ;;  %775 = vmatmul.msk.f32.vlgmr.msra.gmra.mxu1 %vm160_vm1, %v809_v56 }
 0x243   :  { %551 = vmatpush.msrb.mxu2 %v944_v0  ;;  %596 = vmatpush.msra.mxu1 %v1004_v11 }
 0x244   :  { %576 = vmatpush.msrb.mxu3 %v969_v6 }
 0x245   :  { %552 = vmatpush.msrb.mxu2 %v952_v2  ;;  %597 = vmatpush.msra.mxu1 %v1016_v13 }
 0x246   :  { %577 = vmatpush.msrb.mxu3 %v992_v9 }
 0x247   :  { %553 = vmatpush.msrb.mxu2 %v964_v5  ;;  %598 = vmatpush.msra.mxu1 %v1021_v14 }
 0x248   :  { %578 = vmatpush.msrb.mxu3 %v998_v10 }
 0x249   :  { %554 = vmatpush.msrb.mxu2 %v977_v7  ;;  %599 = vmatpush.msra.mxu1 %v1028_v15 }
 0x24a   :  { %579 = vmatpush.msrb.mxu3 %v1009_v12 }
 0x2bf   :  { %v461_v60 = vpop.f32.mrf.mxu1 }
 0x2c4   :  { %v441_v61 = vpop.f32.mrf.mxu3 }
 0x2c5   :  { %v416_v62 = vpop.f32.mrf.mxu2  ;;  %v462_v63 = vadd.f32 %v461_v60, %v441_v61 }
 0x2c6   :  { %v419_v1 = vadd.f32 %v416_v62, %v131_v59 }
 0x2c7   :  { %v464_v3 = vadd.f32 %v1070_v25, %v462_v63 }
 0x2c8   :  { %810 = vtanh.f32 %v419_v1 }
 0x2c9   :  { %812 = vtanh.f32 %v464_v3 }
 0x2ce   :  { %v811_v4 = vpop.eup %810 }
 0x2cf   :  { %v813_v8 = vpop.eup %812  ;;  %776 = vmatmul.msk.f32.vlgmr.msra.gmra.mxu2 %vm160_vm1, %v811_v4  ;;  %778 = vmatmul.msk.f32.vlgmr.msrb.gmra.mxu1 %vm160_vm1, %v811_v4 }
 0x2d0   :  { %777 = vmatmul.msk.f32.vlgmr.msra.gmra.mxu3 %vm160_vm1, %v813_v8  ;;  %621 = vmatpush.msra.mxu2 %v944_v0  ;;  %v68_v0 = vld [vmem:[%s1187_s0 + $0x30] sm:$0xff] }
 0x2d1   :  { %666 = vmatpush.msrb.mxu1 %v1004_v11  ;;  %646 = vmatpush.msra.mxu3 %v969_v6 }
 0x2d2   :  { %622 = vmatpush.msra.mxu2 %v952_v2  ;;  %763 = vmatmul.msk.f32.gmra.mxu0 %vm76_vm0, %v68_v0  ;;  %v133_v2 = vpop.f32.mrf.mxu0 }
 0x2d3   :  { %667 = vmatpush.msrb.mxu1 %v1016_v13  ;;  %647 = vmatpush.msra.mxu3 %v992_v9  ;;  %v134_v16 = vadd.f32 %v1050_v17, %v133_v2 }
 0x2d4   :  { %623 = vmatpush.msra.mxu2 %v964_v5 }
 0x2d5   :  { %668 = vmatpush.msrb.mxu1 %v1021_v14  ;;  %648 = vmatpush.msra.mxu3 %v998_v10 }
 0x2d6   :  { %624 = vmatpush.msra.mxu2 %v977_v7 }
 0x2d7   :  { %669 = vmatpush.msrb.mxu1 %v1028_v15  ;;  %649 = vmatpush.msra.mxu3 %v1009_v12 }
 0x34c   :  { %v531_v18 = vpop.f32.mrf.mxu1 }
 0x34f   :  { %v136_v24 = vpop.f32.mrf.mxu0 }
 0x352   :  { %v486_v5 = vpop.f32.mrf.mxu2 }
 0x353   :  { %v489_v19 = vadd.f32 %v486_v5, %v134_v16  ;;  %v511_v20 = vpop.f32.mrf.mxu3 }
 0x354   :  { %v532_v21 = vadd.f32 %v531_v18, %v511_v20 }
 0x355   :  { %814 = vtanh.f32 %v489_v19 }
 0x356   :  { %v534_v7 = vadd.f32 %v1070_v25, %v532_v21 }
 0x358   :  { %816 = vtanh.f32 %v534_v7 }
 0x35b   :  { %v815_v22 = vpop.eup %814 }
 0x35c   :  { %779 = vmatmul.msk.f32.vlgmr.msrb.gmra.mxu2 %vm160_vm1, %v815_v22  ;;  %781 = vmatmul.msk.f32.vlgmr.msra.gmra.mxu1 %vm160_vm1, %v815_v22 }
 0x35d   :  { %691 = vmatpush.msrb.mxu2 %v969_v6  ;;  %v69_v6 = vld [vmem:[%s1187_s0 + $0x38] sm:$0xff] }
 0x35e   :  { %v817_v23 = vpop.eup %816  ;;  %764 = vmatmul.msk.f32.gmra.mxu0 %vm76_vm0, %v69_v6 }
 0x35f   :  { %780 = vmatmul.msk.f32.vlgmr.msrb.gmra.mxu3 %vm160_vm1, %v817_v23  ;;  %692 = vmatpush.msrb.mxu2 %v992_v9  ;;  %v137_v9 = vadd.f32 %v1050_v17, %v136_v24 }
 0x360   :  { %714 = vmatpush.msrb.mxu3 %v1004_v11 }
 0x361   :  { %693 = vmatpush.msrb.mxu2 %v998_v10 }
 0x362   :  { %715 = vmatpush.msrb.mxu3 %v1016_v13 }
 0x363   :  { %694 = vmatpush.msrb.mxu2 %v1009_v12 }
 0x364   :  { %716 = vmatpush.msrb.mxu3 %v1021_v14 }
 0x366   :  { %717 = vmatpush.msrb.mxu3 %v1028_v15 }
 0x3d9   :  { %v601_v10 = vpop.f32.mrf.mxu1 }
 0x3db   :  { %v139_v31 = vpop.f32.mrf.mxu0 }
 0x3dc   :  { %v140_v32 = vadd.f32 %v1050_v17, %v139_v31 }
 0x3df   :  { %v556_v11 = vpop.f32.mrf.mxu2 }
 0x3e0   :  { %v559_v26 = vadd.f32 %v556_v11, %v137_v9 }
 0x3e2   :  { %818 = vtanh.f32 %v559_v26  ;;  %v581_v13 = vpop.f32.mrf.mxu3 }
 0x3e3   :  { %v602_v27 = vadd.f32 %v601_v10, %v581_v13 }
 0x3e5   :  { %v604_v12 = vadd.f32 %v1070_v25, %v602_v27 }
 0x3e7   :  { %820 = vtanh.f32 %v604_v12 }
 0x3e8   :  { %v819_v14 = vpop.eup %818 }
 0x3e9   :  { %782 = vmatmul.msk.f32.vlgmr.msra.gmra.mxu2 %vm160_vm1, %v819_v14  ;;  %784 = vmatmul.msk.f32.vlgmr.msrb.gmra.mxu1 %vm160_vm1, %v819_v14 }
 0x3ed   :  { %v821_v15 = vpop.eup %820 }
 0x3ee   :  { %783 = vmatmul.msk.f32.vlgmr.msra.gmra.mxu3 %vm160_vm1, %v821_v15 }
 0x466   :  { %v671_v35 = vpop.f32.mrf.mxu1 }
 0x46c   :  { %v626_v33 = vpop.f32.mrf.mxu2 }
 0x46d   :  { %v629_v34 = vadd.f32 %v626_v33, %v140_v32 }
 0x46f   :  { %822 = vtanh.f32 %v629_v34 }
 0x471   :  { %v651_v36 = vpop.f32.mrf.mxu3 }
 0x472   :  { %v672_v37 = vadd.f32 %v671_v35, %v651_v36 }
 0x474   :  { %v674_v38 = vadd.f32 %v1070_v25, %v672_v37 }
 0x475   :  { %v823_v39 = vpop.eup %822 }
 0x476   :  { %824 = vtanh.f32 %v674_v38  ;;  %786 = vmatmul.msk.f32.vlgmr.msrb.gmra.mxu3 %vm160_vm1, %v823_v39 }
 0x47c   :  { %v825_v40 = vpop.eup %824 }
 0x47d   :  { %785 = vmatmul.msk.f32.vlgmr.msrb.gmra.mxu2 %vm160_vm1, %v825_v40 }
 0x4f9   :  { %v719_v42 = vpop.f32.mrf.mxu3 }
 0x500   :  { %v696_v43 = vpop.f32.mrf.mxu2 }
 0x501   :  { %v720_v17 = vadd.f32 %v719_v42, %v696_v43 }
 0x503   :  { %v722_v44 = vadd.f32 %v1070_v25, %v720_v17 }
 0x505   :  { %826 = vtanh.f32 %v722_v44 }
 0x50b   :  { %v827_v45 = vpop.eup %826 }
 0x50c   :  { %787 = vmatmul.msk.f32.vlgmr.msrb.gmra.mxu0 %vm160_vm1, %v827_v45 }
 0x589   :  { %v747_v47 = vpop.f32.mrf.mxu0 }
 0x58a   :  { %v748_v48 = vadd.f32 %v795_v46, %v747_v47 }
 0x58c   :  { %750 = vst [vmem:[%s1196_s9] sm:$0xff] %v748_v48 }
 0x58d   :  { %755 = vsyncpa [#allocation3], 1 }
 0x58e   :  { %756 = vsyncpa [#allocation5], 1 }

</bundles_post_ra>
